<compile_context>
chip_gen: v7x
topology: tpu7x:2x2x1
jax: 0.10.0
libtpu: 0.0.40
codegen_flags: <defaults>
</compile_context>

<pallas_src>
import functools

import jax
import jax.numpy as jnp
from jax.experimental import pallas as pl
from jax.experimental.pallas import tpu as pltpu

PAD_FEAT = 128    # padded in/out feature width (real: num_hidden + 1 = 33)
PAD_HID = 128     # padded hidden width (real: 50)
TILE_B_MAX = 256  # max batch rows per grid step (multiple of 8)


def _round_up(a, b):
    return (a + b - 1) // b * b


def _dynamics_kernel(x_ref,
                     w1_ref, b1_ref,
                     w2_ref, b2_ref,
                     w3_ref, b3_ref,
                     w4_ref, b4_ref,
                     w5_ref, b5_ref,
                     out_ref):
    """5-layer MLP (Linear+ReLU x4, final Linear) on one lane-dense batch tile."""
    h = x_ref[...]  # already f32, no redundant cast

    h = jnp.maximum(
        jnp.dot(h, w1_ref[...], preferred_element_type=jnp.float32) + b1_ref[...], 0.0)
    h = jnp.maximum(
        jnp.dot(h, w2_ref[...], preferred_element_type=jnp.float32) + b2_ref[...], 0.0)
    h = jnp.maximum(
        jnp.dot(h, w3_ref[...], preferred_element_type=jnp.float32) + b3_ref[...], 0.0)
    h = jnp.maximum(
        jnp.dot(h, w4_ref[...], preferred_element_type=jnp.float32) + b4_ref[...], 0.0)
    out = jnp.dot(h, w5_ref[...], preferred_element_type=jnp.float32) + b5_ref[...]

    out_ref[...] = out.astype(out_ref.dtype)


def init_dynamics_params(key, num_hidden, num_actions):
    """Deterministic init matching nn.Linear shapes (weights stored as [in, out]).

    PyTorch nn.Linear(in, out): weight [out, in], bias [out], both
    U(-1/sqrt(in), 1/sqrt(in)).  num_actions is unused in the forward pass
    (kept for signature parity with the module).
    """
    dims = [num_hidden + 1, 50, 50, 50, 50, num_hidden + 1]
    params = []
    for i in range(5):
        fan_in, fan_out = dims[i], dims[i + 1]
        key, kw, kb = jax.random.split(key, 3)
        bound = 1.0 / jnp.sqrt(jnp.float32(fan_in))
        w = jax.random.uniform(kw, (fan_in, fan_out), jnp.float32, -bound, bound)
        b = jax.random.uniform(kb, (1, fan_out), jnp.float32, -bound, bound)
        params.append((w, b))
    return params


def pad_dynamics_params(params, num_hidden):
    """Zero-pad weights/biases to lane-dense [pad_in, pad_out] shapes.

    Padding with zeros keeps the real columns exact through matmul + ReLU.
    """
    pad_dims = [(PAD_FEAT, PAD_HID), (PAD_HID, PAD_HID), (PAD_HID, PAD_HID),
                (PAD_HID, PAD_HID), (PAD_HID, PAD_FEAT)]
    padded = []
    for (w, b), (pin, pout) in zip(params, pad_dims):
        wp = jnp.zeros((pin, pout), jnp.float32).at[:w.shape[0], :w.shape[1]].set(w)
        bp = jnp.zeros((1, pout), jnp.float32).at[:, :b.shape[1]].set(b)
        padded.append((wp, bp))
    return padded


@functools.partial(jax.jit, static_argnames=("num_hidden",))
def dynamics_forward(x, padded_params, *, num_hidden):
    """Runs the Pallas kernel; returns (hidden [B, num_hidden], reward [B])."""
    B, feat = x.shape  # feat == num_hidden + 1

    # Batch tile: big enough to feed the MXU / amortize per-step overhead,
    # but never larger than the (8-aligned) batch itself.
    tile_b = min(TILE_B_MAX, _round_up(B, 8))
    b_pad = _round_up(B, tile_b)

    # Zero-pad batch rows and feature lanes once in the wrapper.
    x_p = jnp.zeros((b_pad, PAD_FEAT), jnp.float32)
    x_p = x_p.at[:B, :feat].set(x.astype(jnp.float32))

    flat_params = []
    for w, b in padded_params:
        flat_params.extend([w, b])

    grid = (pl.cdiv(b_pad, tile_b),)

    x_spec = pl.BlockSpec((tile_b, PAD_FEAT), lambda i: (i, 0))
    out_spec = pl.BlockSpec((tile_b, PAD_FEAT), lambda i: (i, 0))
    # Weights/biases: full-array blocks, same block index for every grid step
    # -> loaded once, VMEM-resident across the whole batch sweep.
    param_specs = [pl.BlockSpec(p.shape, lambda i: (0, 0)) for p in flat_params]

    out = pl.pallas_call(
        _dynamics_kernel,
        out_shape=jax.ShapeDtypeStruct((b_pad, PAD_FEAT), jnp.float32),
        grid=grid,
        in_specs=[x_spec] + param_specs,
        out_specs=out_spec,
        compiler_params=pltpu.CompilerParams(
            dimension_semantics=("parallel",)),  # megacore-shard batch tiles
    )(x_p, *flat_params)

    hidden = out[:B, 0:num_hidden]
    reward = out[:B, num_hidden]  # == out[:, -1] of the real (num_hidden+1)-wide output
    return hidden, reward


if __name__ == "__main__":
    num_hidden = 32
    num_actions = 4   # unused by forward, kept for parity with the module
    batch = 2

    key = jax.random.PRNGKey(0)
    key, kx = jax.random.split(key)
    x = jax.random.normal(kx, (batch, num_hidden + 1), jnp.float32)

    params = init_dynamics_params(key, num_hidden, num_actions)
    padded_params = pad_dynamics_params(params, num_hidden)

    hidden, reward = dynamics_forward(x, padded_params, num_hidden=num_hidden)
    jax.block_until_ready((hidden, reward))

    # Pure-JAX reference check of the same math (unpadded params).
    h_ref = x
    for i, (w, b) in enumerate(params):
        h_ref = h_ref @ w + b
        if i < 4:
            h_ref = jnp.maximum(h_ref, 0.0)
    assert hidden.shape == (batch, num_hidden) and reward.shape == (batch,)
    assert jnp.allclose(hidden, h_ref[:, :num_hidden], atol=1e-5, rtol=1e-5)
    assert jnp.allclose(reward, h_ref[:, -1], atol=1e-5, rtol=1e-5)

    print("KERNEL_OK")
</pallas_src>

<mosaic_0001>
module attributes {stable_mosaic.version = 11 : i64} {
  func.func @_dynamics_kernel(%arg0: i32, %arg1: memref<8x128xf32, #tpu.memory_space<vmem>>, %arg2: memref<128x128xf32, #tpu.memory_space<vmem>>, %arg3: memref<1x128xf32, #tpu.memory_space<vmem>>, %arg4: memref<128x128xf32, #tpu.memory_space<vmem>>, %arg5: memref<1x128xf32, #tpu.memory_space<vmem>>, %arg6: memref<128x128xf32, #tpu.memory_space<vmem>>, %arg7: memref<1x128xf32, #tpu.memory_space<vmem>>, %arg8: memref<128x128xf32, #tpu.memory_space<vmem>>, %arg9: memref<1x128xf32, #tpu.memory_space<vmem>>, %arg10: memref<128x128xf32, #tpu.memory_space<vmem>>, %arg11: memref<1x128xf32, #tpu.memory_space<vmem>>, %arg12: memref<8x128xf32, #tpu.memory_space<vmem>>) attributes {dimension_semantics = [#tpu.dimension_semantics<parallel>], iteration_bounds = array<i64: 1>, scalar_prefetch = 0 : i64, scratch_operands = 0 : i64, tpu.core_type = #tpu.core_type<tc>, window_params = [{transform_indices = @transform_0, window_bounds = array<i64: 8, 128>}, {pipeline_mode = #tpu.pipeline_mode<synchronous>, transform_indices = @transform_1, window_bounds = array<i64: 128, 128>}, {pipeline_mode = #tpu.pipeline_mode<synchronous>, transform_indices = @transform_2, window_bounds = array<i64: 1, 128>}, {pipeline_mode = #tpu.pipeline_mode<synchronous>, transform_indices = @transform_3, window_bounds = array<i64: 128, 128>}, {pipeline_mode = #tpu.pipeline_mode<synchronous>, transform_indices = @transform_4, window_bounds = array<i64: 1, 128>}, {pipeline_mode = #tpu.pipeline_mode<synchronous>, transform_indices = @transform_5, window_bounds = array<i64: 128, 128>}, {pipeline_mode = #tpu.pipeline_mode<synchronous>, transform_indices = @transform_6, window_bounds = array<i64: 1, 128>}, {pipeline_mode = #tpu.pipeline_mode<synchronous>, transform_indices = @transform_7, window_bounds = array<i64: 128, 128>}, {pipeline_mode = #tpu.pipeline_mode<synchronous>, transform_indices = @transform_8, window_bounds = array<i64: 1, 128>}, {pipeline_mode = #tpu.pipeline_mode<synchronous>, transform_indices = @transform_9, window_bounds = array<i64: 128, 128>}, {pipeline_mode = #tpu.pipeline_mode<synchronous>, transform_indices = @transform_10, window_bounds = array<i64: 1, 128>}, {transform_indices = @transform_11, window_bounds = array<i64: 8, 128>}]} {
    %c0 = arith.constant 0 : index
    %c0_0 = arith.constant 0 : index
    %0 = vector.load %arg1[%c0, %c0_0] : memref<8x128xf32, #tpu.memory_space<vmem>>, vector<8x128xf32>
    %c0_1 = arith.constant 0 : index
    %c0_2 = arith.constant 0 : index
    %1 = vector.load %arg2[%c0_1, %c0_2] : memref<128x128xf32, #tpu.memory_space<vmem>>, vector<128x128xf32>
    %cst = arith.constant dense<0.000000e+00> : vector<8x128xf32>
    %2 = tpu.matmul %0, %1, %cst {dimension_numbers = #tpu.dot_dimension_numbers<[1], [0], [0], [1], [0, 0, 1, 1], [], []>} : vector<8x128xf32>, vector<128x128xf32>, vector<8x128xf32> -> vector<8x128xf32>
    %c0_3 = arith.constant 0 : index
    %c0_4 = arith.constant 0 : index
    %3 = vector.load %arg3[%c0_3, %c0_4] : memref<1x128xf32, #tpu.memory_space<vmem>>, vector<1x128xf32>
    %4 = vector.broadcast %3 : vector<1x128xf32> to vector<8x128xf32>
    %5 = arith.addf %2, %4 : vector<8x128xf32>
    %cst_5 = arith.constant 0.000000e+00 : f32
    %6 = vector.broadcast %cst_5 : f32 to vector<8x128xf32>
    %7 = arith.maximumf %5, %6 : vector<8x128xf32>
    %c0_6 = arith.constant 0 : index
    %c0_7 = arith.constant 0 : index
    %8 = vector.load %arg4[%c0_6, %c0_7] : memref<128x128xf32, #tpu.memory_space<vmem>>, vector<128x128xf32>
    %cst_8 = arith.constant dense<0.000000e+00> : vector<8x128xf32>
    %9 = tpu.matmul %7, %8, %cst_8 {dimension_numbers = #tpu.dot_dimension_numbers<[1], [0], [0], [1], [0, 0, 1, 1], [], []>} : vector<8x128xf32>, vector<128x128xf32>, vector<8x128xf32> -> vector<8x128xf32>
    %c0_9 = arith.constant 0 : index
    %c0_10 = arith.constant 0 : index
    %10 = vector.load %arg5[%c0_9, %c0_10] : memref<1x128xf32, #tpu.memory_space<vmem>>, vector<1x128xf32>
    %11 = vector.broadcast %10 : vector<1x128xf32> to vector<8x128xf32>
    %12 = arith.addf %9, %11 : vector<8x128xf32>
    %cst_11 = arith.constant 0.000000e+00 : f32
    %13 = vector.broadcast %cst_11 : f32 to vector<8x128xf32>
    %14 = arith.maximumf %12, %13 : vector<8x128xf32>
    %c0_12 = arith.constant 0 : index
    %c0_13 = arith.constant 0 : index
    %15 = vector.load %arg6[%c0_12, %c0_13] : memref<128x128xf32, #tpu.memory_space<vmem>>, vector<128x128xf32>
    %cst_14 = arith.constant dense<0.000000e+00> : vector<8x128xf32>
    %16 = tpu.matmul %14, %15, %cst_14 {dimension_numbers = #tpu.dot_dimension_numbers<[1], [0], [0], [1], [0, 0, 1, 1], [], []>} : vector<8x128xf32>, vector<128x128xf32>, vector<8x128xf32> -> vector<8x128xf32>
    %c0_15 = arith.constant 0 : index
    %c0_16 = arith.constant 0 : index
    %17 = vector.load %arg7[%c0_15, %c0_16] : memref<1x128xf32, #tpu.memory_space<vmem>>, vector<1x128xf32>
    %18 = vector.broadcast %17 : vector<1x128xf32> to vector<8x128xf32>
    %19 = arith.addf %16, %18 : vector<8x128xf32>
    %cst_17 = arith.constant 0.000000e+00 : f32
    %20 = vector.broadcast %cst_17 : f32 to vector<8x128xf32>
    %21 = arith.maximumf %19, %20 : vector<8x128xf32>
    %c0_18 = arith.constant 0 : index
    %c0_19 = arith.constant 0 : index
    %22 = vector.load %arg8[%c0_18, %c0_19] : memref<128x128xf32, #tpu.memory_space<vmem>>, vector<128x128xf32>
    %cst_20 = arith.constant dense<0.000000e+00> : vector<8x128xf32>
    %23 = tpu.matmul %21, %22, %cst_20 {dimension_numbers = #tpu.dot_dimension_numbers<[1], [0], [0], [1], [0, 0, 1, 1], [], []>} : vector<8x128xf32>, vector<128x128xf32>, vector<8x128xf32> -> vector<8x128xf32>
    %c0_21 = arith.constant 0 : index
    %c0_22 = arith.constant 0 : index
    %24 = vector.load %arg9[%c0_21, %c0_22] : memref<1x128xf32, #tpu.memory_space<vmem>>, vector<1x128xf32>
    %25 = vector.broadcast %24 : vector<1x128xf32> to vector<8x128xf32>
    %26 = arith.addf %23, %25 : vector<8x128xf32>
    %cst_23 = arith.constant 0.000000e+00 : f32
    %27 = vector.broadcast %cst_23 : f32 to vector<8x128xf32>
    %28 = arith.maximumf %26, %27 : vector<8x128xf32>
    %c0_24 = arith.constant 0 : index
    %c0_25 = arith.constant 0 : index
    %29 = vector.load %arg10[%c0_24, %c0_25] : memref<128x128xf32, #tpu.memory_space<vmem>>, vector<128x128xf32>
    %cst_26 = arith.constant dense<0.000000e+00> : vector<8x128xf32>
    %30 = tpu.matmul %28, %29, %cst_26 {dimension_numbers = #tpu.dot_dimension_numbers<[1], [0], [0], [1], [0, 0, 1, 1], [], []>} : vector<8x128xf32>, vector<128x128xf32>, vector<8x128xf32> -> vector<8x128xf32>
    %c0_27 = arith.constant 0 : index
    %c0_28 = arith.constant 0 : index
    %31 = vector.load %arg11[%c0_27, %c0_28] : memref<1x128xf32, #tpu.memory_space<vmem>>, vector<1x128xf32>
    %32 = vector.broadcast %31 : vector<1x128xf32> to vector<8x128xf32>
    %33 = arith.addf %30, %32 : vector<8x128xf32>
    %c0_29 = arith.constant 0 : index
    %c0_30 = arith.constant 0 : index
    %34 = vector.load %arg12[%c0_29, %c0_30] : memref<8x128xf32, #tpu.memory_space<vmem>>, vector<8x128xf32>
    tpu.vector_store %arg12[%c0_29, %c0_30], %33 {strides = array<i32>} : memref<8x128xf32, #tpu.memory_space<vmem>>, vector<8x128xf32>,
    return
  }
  func.func @transform_0(%arg0: i32) -> (i32, i32) {
    %c0_i32 = arith.constant 0 : i32
    %c0_i32_0 = arith.constant 0 : i32
    return %arg0, %c0_i32 : i32, i32
  }
  func.func @transform_1(%arg0: i32) -> (i32, i32) {
    %c0_i32 = arith.constant 0 : i32
    %c0_i32_0 = arith.constant 0 : i32
    %c0_i32_1 = arith.constant 0 : i32
    return %c0_i32, %c0_i32_0 : i32, i32
  }
  func.func @transform_2(%arg0: i32) -> (i32, i32) {
    %c0_i32 = arith.constant 0 : i32
    %c0_i32_0 = arith.constant 0 : i32
    %c0_i32_1 = arith.constant 0 : i32
    return %c0_i32, %c0_i32_0 : i32, i32
  }
  func.func @transform_3(%arg0: i32) -> (i32, i32) {
    %c0_i32 = arith.constant 0 : i32
    %c0_i32_0 = arith.constant 0 : i32
    %c0_i32_1 = arith.constant 0 : i32
    return %c0_i32, %c0_i32_0 : i32, i32
  }
  func.func @transform_4(%arg0: i32) -> (i32, i32) {
    %c0_i32 = arith.constant 0 : i32
    %c0_i32_0 = arith.constant 0 : i32
    %c0_i32_1 = arith.constant 0 : i32
    return %c0_i32, %c0_i32_0 : i32, i32
  }
  func.func @transform_5(%arg0: i32) -> (i32, i32) {
    %c0_i32 = arith.constant 0 : i32
    %c0_i32_0 = arith.constant 0 : i32
    %c0_i32_1 = arith.constant 0 : i32
    return %c0_i32, %c0_i32_0 : i32, i32
  }
  func.func @transform_6(%arg0: i32) -> (i32, i32) {
    %c0_i32 = arith.constant 0 : i32
    %c0_i32_0 = arith.constant 0 : i32
    %c0_i32_1 = arith.constant 0 : i32
    return %c0_i32, %c0_i32_0 : i32, i32
  }
  func.func @transform_7(%arg0: i32) -> (i32, i32) {
    %c0_i32 = arith.constant 0 : i32
    %c0_i32_0 = arith.constant 0 : i32
    %c0_i32_1 = arith.constant 0 : i32
    return %c0_i32, %c0_i32_0 : i32, i32
  }
  func.func @transform_8(%arg0: i32) -> (i32, i32) {
    %c0_i32 = arith.constant 0 : i32
    %c0_i32_0 = arith.constant 0 : i32
    %c0_i32_1 = arith.constant 0 : i32
    return %c0_i32, %c0_i32_0 : i32, i32
  }
  func.func @transform_9(%arg0: i32) -> (i32, i32) {
    %c0_i32 = arith.constant 0 : i32
    %c0_i32_0 = arith.constant 0 : i32
    %c0_i32_1 = arith.constant 0 : i32
    return %c0_i32, %c0_i32_0 : i32, i32
  }
  func.func @transform_10(%arg0: i32) -> (i32, i32) {
    %c0_i32 = arith.constant 0 : i32
    %c0_i32_0 = arith.constant 0 : i32
    %c0_i32_1 = arith.constant 0 : i32
    return %c0_i32, %c0_i32_0 : i32, i32
  }
  func.func @transform_11(%arg0: i32) -> (i32, i32) {
    %c0_i32 = arith.constant 0 : i32
    %c0_i32_0 = arith.constant 0 : i32
    return %arg0, %c0_i32 : i32, i32
  }
}

</mosaic_0001>

<bundles_post_ra>
// kernel: dynamics_forward.1
= control target key start
LH: loop header
LB: loop body
LE: loop exit
PB: predicated region body
PF: predicated region fallthrough
CT: control target
= control target key end

     0   :  { %16 = vsyncpa [#allocation3], 0  ;;  %s1325_s0 = inlined_call_operand.vmem [shape: f32[8,128], index: 0, kind: input, shape index: {}]   ;;  %s1326_s1 = inlined_call_operand.hbm [shape: f32[128,128], index: 1, kind: input, shape index: {}]   ;;  %s1327_s2 = inlined_call_operand.vmem [shape: f32[1,128], index: 2, kind: input, shape index: {}]   ;;  %s1328_s3 = inlined_call_operand.hbm [shape: f32[128,128], index: 3, kind: input, shape index: {}]   ;;  %s1329_s4 = inlined_call_operand.vmem [shape: f32[1,128], index: 4, kind: input, shape index: {}]   ;;  %s1330_s5 = inlined_call_operand.hbm [shape: f32[128,128], index: 5, kind: input, shape index: {}]   ;;  %s1331_s6 = inlined_call_operand.vmem [shape: f32[1,128], index: 6, kind: input, shape index: {}]   ;;  %s1332_s7 = inlined_call_operand.hbm [shape: f32[128,128], index: 7, kind: input, shape index: {}]   ;;  %s1333_s8 = inlined_call_operand.vmem [shape: f32[1,128], index: 8, kind: input, shape index: {}]   ;;  %s1334_s9 = inlined_call_operand.hbm [shape: f32[128,128], index: 9, kind: input, shape index: {}]   ;;  %s1335_s10 = inlined_call_operand.vmem [shape: f32[1,128], index: 10, kind: input, shape index: {}]   ;;  %s1336_s11 = inlined_call_operand.vmem [shape: f32[8,128], index: 11, kind: output, shape index: {}]  }
   0x1   :  { %17 = vsyncpa [#allocation5], 0 }
   0x2   :  { %18 = vsyncpa [#allocation8], 0  ;;  %s1095_s17 = smov [#allocation4]   ;;  %s1096_s19 = smov [#allocation7]  }
   0x3   :  { %s40_s18 = sshll.u32 %s1095_s17, 4  ;;  %s68_s20 = sshll.u32 %s1096_s19, 4  ;;  %s41_s18 = int_to_ptr.vmem [resolvable:$true] %s40_s18  ;;  %s1165_s20 = int_to_ptr.vmem [resolvable:$true] %s68_s20 }
   0x4   :  { %s979_s23 = scalar_lea.hbm %s1328_s3, 2048 }
   0x5   :  { %p980_p0 = scmp.ne.s32.totalorder %s1328_s3, %s979_s23  ;;  %p983_p1 = scmp.lt.u32.totalorder %s979_s23, %s1328_s3 }
   0x7   :  { %p985_p2 = pnand %p983_p1, %p980_p0 }
   0x9   :  { %988 = shalt.err (!%p985_p2)
}
   0xa   :  { %s989_s28 = scalar_lea.vmem %s41_s18, 2048  ;;  %p994_p4 = scmp.lt.s32.totalorder %s41_s18, %s41_s18 }
   0xb   :  { %p990_p3 = scmp.ne.s32.totalorder %s41_s18, %s989_s28  ;;  %p995_p5 = scmp.lt.s32.totalorder %s989_s28, %s989_s28 }
   0xd   :  { %p996_p6 = por %p995_p5, %p994_p4 }
   0xf   :  { %p997_p7 = pnand %p996_p6, %p990_p3 }
  0x11   :  { %1000 = shalt.err (!%p997_p7)
}
  0x12   :  { %s1097_s29 = smov 128   ;;  %s1098_s30 = smov 8  }
  0x13   :  { %46 = dma.hbm_to_vmem [thread:$0]  %s1328_s3, 2048, %s41_s18, [#allocation5], %s1097_s29, %s1097_s29, %s1098_s30  }
  0x14   :  { %s1001_s16 = scalar_lea.hbm %s1332_s7, 2048 }
  0x15   :  { %p1002_p8 = scmp.ne.s32.totalorder %s1332_s7, %s1001_s16  ;;  %p1005_p9 = scmp.lt.u32.totalorder %s1001_s16, %s1332_s7 }
  0x17   :  { %p1007_p10 = pnand %p1005_p9, %p1002_p8 }
  0x19   :  { %1010 = shalt.err (!%p1007_p10)
}
  0x1a   :  { %s1011_s23 = scalar_lea.vmem %s1165_s20, 2048  ;;  %p1016_p12 = scmp.lt.s32.totalorder %s1165_s20, %s1165_s20 }
  0x1b   :  { %p1012_p11 = scmp.ne.s32.totalorder %s1165_s20, %s1011_s23  ;;  %p1017_p13 = scmp.lt.s32.totalorder %s1011_s23, %s1011_s23 }
  0x1d   :  { %p1018_p0 = por %p1017_p13, %p1016_p12 }
  0x1f   :  { %p1019_p1 = pnand %p1018_p0, %p1012_p11 }
  0x21   :  { %1022 = shalt.err (!%p1019_p1)
}
  0x22   :  { %74 = dma.hbm_to_vmem [thread:$0]  %s1332_s7, 2048, %s1165_s20, [#allocation8], %s1097_s29, %s1097_s29, %s1098_s30  }
  0x23   :  { %s1099_s24 = smov [#allocation2]   ;;  %s1100_s26 = smov [#allocation6]  }
  0x24   :  { %s26_s25 = sshll.u32 %s1099_s24, 4  ;;  %s54_s27 = sshll.u32 %s1100_s26, 4  ;;  %s27_s25 = int_to_ptr.vmem [resolvable:$true] %s26_s25  ;;  %s1202_s27 = int_to_ptr.vmem [resolvable:$true] %s54_s27 }
  0x25   :  { %s1023_s13 = scalar_lea.hbm %s1326_s1, 2048 }
  0x26   :  { %p1024_p2 = scmp.ne.s32.totalorder %s1326_s1, %s1023_s13  ;;  %p1027_p3 = scmp.lt.u32.totalorder %s1023_s13, %s1326_s1 }
  0x28   :  { %p1029_p4 = pnand %p1027_p3, %p1024_p2 }
  0x2a   :  { %1032 = shalt.err (!%p1029_p4)
}
  0x2b   :  { %s1033_s7 = scalar_lea.vmem %s27_s25, 2048  ;;  %p1038_p6 = scmp.lt.s32.totalorder %s27_s25, %s27_s25 }
  0x2c   :  { %p1034_p5 = scmp.ne.s32.totalorder %s27_s25, %s1033_s7  ;;  %p1039_p7 = scmp.lt.s32.totalorder %s1033_s7, %s1033_s7 }
  0x2e   :  { %p1040_p8 = por %p1039_p7, %p1038_p6 }
  0x30   :  { %p1041_p9 = pnand %p1040_p8, %p1034_p5 }
  0x32   :  { %1044 = shalt.err (!%p1041_p9)
}
  0x33   :  { %32 = dma.hbm_to_vmem [thread:$0]  %s1326_s1, 2048, %s27_s25, [#allocation3], %s1097_s29, %s1097_s29, %s1098_s30  }
  0x34   :  { %s1045_s23 = scalar_lea.hbm %s1330_s5, 2048 }
  0x35   :  { %p1046_p10 = scmp.ne.s32.totalorder %s1330_s5, %s1045_s23  ;;  %p1049_p11 = scmp.lt.u32.totalorder %s1045_s23, %s1330_s5 }
  0x37   :  { %p1051_p12 = pnand %p1049_p11, %p1046_p10 }
  0x39   :  { %1054 = shalt.err (!%p1051_p12)
}
  0x3a   :  { %s1055_s28 = scalar_lea.vmem %s1202_s27, 2048  ;;  %p1060_p0 = scmp.lt.s32.totalorder %s1202_s27, %s1202_s27 }
  0x3b   :  { %p1056_p13 = scmp.ne.s32.totalorder %s1202_s27, %s1055_s28  ;;  %p1061_p1 = scmp.lt.s32.totalorder %s1055_s28, %s1055_s28 }
  0x3d   :  { %p1062_p2 = por %p1061_p1, %p1060_p0 }
  0x3f   :  { %p1063_p3 = pnand %p1062_p2, %p1056_p13 }
  0x41   :  { %1066 = shalt.err (!%p1063_p3)
}
  0x42   :  { %60 = dma.hbm_to_vmem [thread:$0]  %s1330_s5, 2048, %s1202_s27, [#allocation5], %s1097_s29, %s1097_s29, %s1098_s30  }
  0x43   :  { %s1101_s12 = smov [#allocation9]   ;;  %s1067_s16 = scalar_lea.hbm %s1334_s9, 2048 }
  0x44   :  { %s82_s13 = sshll.u32 %s1101_s12, 4  ;;  %p1068_p4 = scmp.ne.s32.totalorder %s1334_s9, %s1067_s16  ;;  %s83_s13 = int_to_ptr.vmem [resolvable:$true] %s82_s13 }
  0x45   :  { %p1071_p5 = scmp.lt.u32.totalorder %s1067_s16, %s1334_s9 }
  0x47   :  { %p1073_p6 = pnand %p1071_p5, %p1068_p4 }
  0x49   :  { %1076 = shalt.err (!%p1073_p6)
}
  0x4a   :  { %s1077_s21 = scalar_lea.vmem %s83_s13, 2048  ;;  %p1082_p8 = scmp.lt.s32.totalorder %s83_s13, %s83_s13 }
  0x4b   :  { %p1078_p7 = scmp.ne.s32.totalorder %s83_s13, %s1077_s21  ;;  %p1083_p9 = scmp.lt.s32.totalorder %s1077_s21, %s1077_s21 }
  0x4d   :  { %p1084_p10 = por %p1083_p9, %p1082_p8 }
  0x4f   :  { %p1085_p11 = pnand %p1084_p10, %p1078_p7 }
  0x51   :  { %1088 = shalt.err (!%p1085_p11)
}
  0x52   :  { %88 = dma.hbm_to_vmem [thread:$0]  %s1334_s9, 2048, %s83_s13, [#allocation8], %s1097_s29, %s1097_s29, %s1098_s30  }
  0x53   :  { %1089 = dma.done.wait [#allocation3], 2048  }
  0x54   :  { %1090 = vsyncadd [#allocation3], 4294965248 }
  0x55   :  { %1091 = dma.done.wait [#allocation5], 4096  }
  0x56   :  { %1092 = vsyncadd [#allocation5], 4294963200 }
  0x57   :  { %1093 = dma.done.wait [#allocation8], 4096  }
  0x58   :  { %1094 = vsyncadd [#allocation8], 4294963200  ;;  %v1102_v0 = vmov 0.0|0.0   ;;  %vm1103_vm0 = vmmov 0   ;;  %v1104_v1 = vmov 0.0   ;;  %v107_v2 = vld [vmem:[#allocation2] sm:$0xff] }
  0x59   :  { %849 = vmatprep.subr.bf16.mxu0 %v1102_v0  ;;  %706 = vmatprep.mubr.msk.f32.mxu0 %vm1103_vm0, %v1104_v1  ;;  %v108_v3 = vld [vmem:[#allocation2 + $0x8] sm:$0xff]  ;;  %v109_v4 = vld [vmem:[#allocation2 + $0x10] sm:$0xff]  ;;  %v110_v6 = vld [vmem:[#allocation2 + $0x18] sm:$0xff] }
  0x5a   :  { %873 = vmatprep.subr.bf16.mxu1 %v1102_v0  ;;  %741 = vmatprep.mubr.msk.f32.mxu1 %vm1103_vm0, %v1104_v1  ;;  %v850_v5 = vpack.c.bf16 %v108_v3, %v107_v2  ;;  %v853_v7 = vpack.c.bf16 %v110_v6, %v109_v4  ;;  %v111_v8 = vld [vmem:[#allocation2 + $0x20] sm:$0xff]  ;;  %v112_v9 = vld [vmem:[#allocation2 + $0x28] sm:$0xff]  ;;  %v203_v12 = vld [vmem:[#allocation4 + $0x10] sm:$0xff] }
  0x5b   :  { %v201_v10 = vld [vmem:[#allocation4] sm:$0xff]  ;;  %v202_v11 = vld [vmem:[#allocation4 + $0x8] sm:$0xff]  ;;  %v204_v13 = vld [vmem:[#allocation4 + $0x18] sm:$0xff]  ;;  %v856_v14 = vpack.c.bf16 %v112_v9, %v111_v8 }
  0x5c   :  { %851 = vmatpush3.bf16.msra.mxu0 %v850_v5  ;;  %v874_v15 = vpack.c.bf16 %v202_v11, %v201_v10  ;;  %v113_v16 = vld [vmem:[#allocation2 + $0x30] sm:$0xff]  ;;  %v114_v17 = vld [vmem:[#allocation2 + $0x38] sm:$0xff]  ;;  %v877_v18 = vpack.c.bf16 %v204_v13, %v203_v12  ;;  %v205_v19 = vld [vmem:[#allocation4 + $0x20] sm:$0xff] }
  0x5d   :  { %852 = vmatprep.subr.bf16.mxu0 %v1102_v0  ;;  %v206_v20 = vld [vmem:[#allocation4 + $0x28] sm:$0xff]  ;;  %v859_v21 = vpack.c.bf16 %v114_v17, %v113_v16  ;;  %v115_v22 = vld [vmem:[#allocation2 + $0x40] sm:$0xff]  ;;  %v207_v25 = vld [vmem:[#allocation4 + $0x30] sm:$0xff] }
  0x5e   :  { %875 = vmatpush3.bf16.msra.mxu1 %v874_v15  ;;  %v116_v23 = vld [vmem:[#allocation2 + $0x48] sm:$0xff]  ;;  %v880_v24 = vpack.c.bf16 %v206_v20, %v205_v19  ;;  %v208_v26 = vld [vmem:[#allocation4 + $0x38] sm:$0xff]  ;;  %v117_v28 = vld [vmem:[#allocation2 + $0x50] sm:$0xff] }
  0x5f   :  { %876 = vmatprep.subr.bf16.mxu1 %v1102_v0  ;;  %v862_v27 = vpack.c.bf16 %v116_v23, %v115_v22  ;;  %v118_v29 = vld [vmem:[#allocation2 + $0x58] sm:$0xff]  ;;  %v883_v30 = vpack.c.bf16 %v208_v26, %v207_v25  ;;  %v209_v31 = vld [vmem:[#allocation4 + $0x40] sm:$0xff]  ;;  %v210_v32 = vld [vmem:[#allocation4 + $0x48] sm:$0xff] }
  0x60   :  { %854 = vmatpush3.bf16.msra.mxu0 %v853_v7  ;;  %v865_v33 = vpack.c.bf16 %v118_v29, %v117_v28  ;;  %v119_v34 = vld [vmem:[#allocation2 + $0x60] sm:$0xff]  ;;  %v120_v35 = vld [vmem:[#allocation2 + $0x68] sm:$0xff]  ;;  %v886_v36 = vpack.c.bf16 %v210_v32, %v209_v31  ;;  %v211_v37 = vld [vmem:[#allocation4 + $0x50] sm:$0xff] }
  0x61   :  { %855 = vmatprep.subr.bf16.mxu0 %v1102_v0  ;;  %v212_v38 = vld [vmem:[#allocation4 + $0x58] sm:$0xff]  ;;  %v868_v39 = vpack.c.bf16 %v120_v35, %v119_v34  ;;  %v121_v40 = vld [vmem:[#allocation2 + $0x70] sm:$0xff]  ;;  %v213_v43 = vld [vmem:[#allocation4 + $0x60] sm:$0xff] }
  0x62   :  { %878 = vmatpush3.bf16.msra.mxu1 %v877_v18  ;;  %v122_v41 = vld [vmem:[#allocation2 + $0x78] sm:$0xff]  ;;  %v889_v42 = vpack.c.bf16 %v212_v38, %v211_v37  ;;  %v214_v44 = vld [vmem:[#allocation4 + $0x68] sm:$0xff]  ;;  %v106_v47 = vld [vmem:[%s1325_s0] sm:$0xff] }
  0x63   :  { %879 = vmatprep.subr.bf16.mxu1 %v1102_v0  ;;  %v871_v45 = vpack.c.bf16 %v122_v41, %v121_v40  ;;  %v892_v46 = vpack.c.bf16 %v214_v44, %v213_v43  ;;  %v215_v48 = vld [vmem:[#allocation4 + $0x70] sm:$0xff]  ;;  %v216_v49 = vld [vmem:[#allocation4 + $0x78] sm:$0xff]  ;;  %v295_v51 = vld [vmem:[#allocation6] sm:$0xff] }
  0x64   :  { %857 = vmatpush3.bf16.msra.mxu0 %v856_v14  ;;  %v895_v50 = vpack.c.bf16 %v216_v49, %v215_v48  ;;  %v296_v52 = vld [vmem:[#allocation6 + $0x8] sm:$0xff]  ;;  %v297_v53 = vld [vmem:[#allocation6 + $0x10] sm:$0xff]  ;;  %v298_v55 = vld [vmem:[#allocation6 + $0x18] sm:$0xff] }
  0x65   :  { %858 = vmatprep.subr.bf16.mxu0 %v1102_v0  ;;  %v898_v54 = vpack.c.bf16 %v296_v52, %v295_v51  ;;  %v901_v56 = vpack.c.bf16 %v298_v55, %v297_v53  ;;  %v299_v57 = vld [vmem:[#allocation6 + $0x20] sm:$0xff]  ;;  %v300_v58 = vld [vmem:[#allocation6 + $0x28] sm:$0xff]  ;;  %v301_v60 = vld [vmem:[#allocation6 + $0x30] sm:$0xff] }
  0x66   :  { %881 = vmatpush3.bf16.msra.mxu1 %v880_v24  ;;  %v904_v59 = vpack.c.bf16 %v300_v58, %v299_v57  ;;  %v302_v61 = vld [vmem:[#allocation6 + $0x38] sm:$0xff]  ;;  %v303_v63 = vld [vmem:[#allocation6 + $0x40] sm:$0xff]  ;;  %v304_v2 = vld [vmem:[#allocation6 + $0x48] sm:$0xff] }
  0x67   :  { %882 = vmatprep.subr.bf16.mxu1 %v1102_v0  ;;  %v907_v62 = vpack.c.bf16 %v302_v61, %v301_v60  ;;  %v910_v3 = vpack.c.bf16 %v304_v2, %v303_v63  ;;  %v305_v4 = vld [vmem:[#allocation6 + $0x50] sm:$0xff]  ;;  %v306_v5 = vld [vmem:[#allocation6 + $0x58] sm:$0xff]  ;;  %v307_v7 = vld [vmem:[#allocation6 + $0x60] sm:$0xff] }
  0x68   :  { %860 = vmatpush3.bf16.msra.mxu0 %v859_v21  ;;  %v913_v6 = vpack.c.bf16 %v306_v5, %v305_v4  ;;  %v308_v8 = vld [vmem:[#allocation6 + $0x68] sm:$0xff]  ;;  %v584_v10 = vld [vmem:[%s1327_s2] ss:$0 sm:$0xff]  ;;  %v309_v15 = vld [vmem:[#allocation6 + $0x70] sm:$0xff] }
  0x69   :  { %861 = vmatprep.subr.bf16.mxu0 %v1102_v0  ;;  %v916_v9 = vpack.c.bf16 %v308_v8, %v307_v7  ;;  %v310_v16 = vld [vmem:[#allocation6 + $0x78] sm:$0xff]  ;;  %v389_v18 = vld [vmem:[#allocation7] sm:$0xff]  ;;  %v390_v19 = vld [vmem:[#allocation7 + $0x8] sm:$0xff] }
  0x6a   :  { %884 = vmatpush3.bf16.msra.mxu1 %v883_v30  ;;  %v919_v17 = vpack.c.bf16 %v310_v16, %v309_v15  ;;  %v391_v20 = vld [vmem:[#allocation7 + $0x10] sm:$0xff]  ;;  %v922_v21 = vpack.c.bf16 %v390_v19, %v389_v18  ;;  %v392_v22 = vld [vmem:[#allocation7 + $0x18] sm:$0xff]  ;;  %v393_v24 = vld [vmem:[#allocation7 + $0x20] sm:$0xff] }
  0x6b   :  { %885 = vmatprep.subr.bf16.mxu1 %v1102_v0  ;;  %v925_v23 = vpack.c.bf16 %v392_v22, %v391_v20  ;;  %v394_v25 = vld [vmem:[#allocation7 + $0x28] sm:$0xff]  ;;  %v396_v28 = vld [vmem:[#allocation7 + $0x38] sm:$0xff]  ;;  %v397_v30 = vld [vmem:[#allocation7 + $0x40] sm:$0xff] }
  0x6c   :  { %863 = vmatpush3.bf16.msra.mxu0 %v862_v27  ;;  %v928_v26 = vpack.c.bf16 %v394_v25, %v393_v24  ;;  %v395_v27 = vld [vmem:[#allocation7 + $0x30] sm:$0xff]  ;;  %v398_v31 = vld [vmem:[#allocation7 + $0x48] sm:$0xff]  ;;  %v400_v34 = vld [vmem:[#allocation7 + $0x58] sm:$0xff] }
  0x6d   :  { %864 = vmatprep.subr.bf16.mxu0 %v1102_v0  ;;  %v931_v29 = vpack.c.bf16 %v396_v28, %v395_v27  ;;  %v934_v32 = vpack.c.bf16 %v398_v31, %v397_v30  ;;  %v402_v37 = vld [vmem:[#allocation7 + $0x68] sm:$0xff]  ;;  %v403_v44 = vld [vmem:[#allocation7 + $0x70] sm:$0xff]  ;;  %v486_v51 = vld [vmem:[#allocation9 + $0x18] sm:$0xff] }
  0x6e   :  { %887 = vmatpush3.bf16.msra.mxu1 %v886_v36  ;;  %v401_v36 = vld [vmem:[#allocation7 + $0x60] sm:$0xff]  ;;  %v484_v48 = vld [vmem:[#allocation9 + $0x8] sm:$0xff]  ;;  %v485_v49 = vld [vmem:[#allocation9 + $0x10] sm:$0xff] }
  0x6f   :  { %888 = vmatprep.subr.bf16.mxu1 %v1102_v0  ;;  %v940_v38 = vpack.c.bf16 %v402_v37, %v401_v36  ;;  %v949_v52 = vpack.c.bf16 %v486_v51, %v485_v49  ;;  %v487_v53 = vld [vmem:[#allocation9 + $0x20] sm:$0xff]  ;;  %v493_v61 = vld [vmem:[#allocation9 + $0x50] sm:$0xff] }
  0x70   :  { %866 = vmatpush3.bf16.msra.mxu0 %v865_v33  ;;  %v399_v33 = vld [vmem:[#allocation7 + $0x50] sm:$0xff]  ;;  %v491_v58 = vld [vmem:[#allocation9 + $0x40] sm:$0xff] }
  0x71   :  { %867 = vmatprep.subr.bf16.mxu0 %v1102_v0  ;;  %v937_v35 = vpack.c.bf16 %v400_v34, %v399_v33  ;;  %v495_v2 = vld [vmem:[#allocation9 + $0x60] sm:$0xff] }
  0x72   :  { %890 = vmatpush3.bf16.msra.mxu1 %v889_v42  ;;  %v586_v5 = vld [vmem:[%s1331_s6] ss:$0 sm:$0xff] }
  0x73   :  { %891 = vmatprep.subr.bf16.mxu1 %v1102_v0 }
  0x74   :  { %869 = vmatpush3.bf16.msra.mxu0 %v868_v39  ;;  %v585_v39 = vld [vmem:[%s1329_s4] ss:$0 sm:$0xff] }
  0x75   :  { %870 = vmatprep.subr.bf16.mxu0 %v1102_v0 }
  0x76   :  { %893 = vmatpush3.bf16.msra.mxu1 %v892_v46 }
  0x77   :  { %894 = vmatprep.subr.bf16.mxu1 %v1102_v0 }
  0x78   :  { %872 = vmatpush3.bf16.msra.mxu0 %v871_v45  ;;  %v404_v45 = vld [vmem:[#allocation7 + $0x78] sm:$0xff] }
  0x79   :  { %897 = vmatprep.subr.bf16.mxu0 %v1102_v0  ;;  %v943_v46 = vpack.c.bf16 %v404_v45, %v403_v44 }
  0x7a   :  { %896 = vmatpush3.bf16.msra.mxu1 %v895_v50 }
  0x7b   :  { %707 = vmatmul.mubr.f32.vlgmr.msra.gmra.mrb[0].mxu0 %v106_v47  ;;  %921 = vmatprep.subr.bf16.mxu1 %v1102_v0  ;;  %v483_v47 = vld [vmem:[#allocation9] sm:$0xff] }
  0x7c   :  { %776 = vmatprep.mubr.msk.f32.mxu0 %vm1103_vm0, %v1104_v1  ;;  %899 = vmatpush3.bf16.msra.mxu0 %v898_v54  ;;  %v946_v50 = vpack.c.bf16 %v484_v48, %v483_v47  ;;  %v488_v54 = vld [vmem:[#allocation9 + $0x28] sm:$0xff] }
  0x7d   :  { %900 = vmatprep.subr.bf16.mxu0 %v1102_v0  ;;  %v952_v55 = vpack.c.bf16 %v488_v54, %v487_v53 }
  0x80   :  { %902 = vmatpush3.bf16.msra.mxu0 %v901_v56  ;;  %v490_v56 = vld [vmem:[#allocation9 + $0x38] sm:$0xff] }
  0x81   :  { %903 = vmatprep.subr.bf16.mxu0 %v1102_v0 }
  0x84   :  { %905 = vmatpush3.bf16.msra.mxu0 %v904_v59  ;;  %v492_v59 = vld [vmem:[#allocation9 + $0x48] sm:$0xff] }
  0x85   :  { %906 = vmatprep.subr.bf16.mxu0 %v1102_v0  ;;  %v958_v60 = vpack.c.bf16 %v492_v59, %v491_v58 }
  0x88   :  { %908 = vmatpush3.bf16.msra.mxu0 %v907_v62  ;;  %v494_v62 = vld [vmem:[#allocation9 + $0x58] sm:$0xff] }
  0x89   :  { %909 = vmatprep.subr.bf16.mxu0 %v1102_v0  ;;  %v961_v63 = vpack.c.bf16 %v494_v62, %v493_v61 }
  0x8c   :  { %911 = vmatpush3.bf16.msra.mxu0 %v910_v3  ;;  %v496_v3 = vld [vmem:[#allocation9 + $0x68] sm:$0xff] }
  0x8d   :  { %912 = vmatprep.subr.bf16.mxu0 %v1102_v0  ;;  %v964_v4 = vpack.c.bf16 %v496_v3, %v495_v2 }
  0x90   :  { %914 = vmatpush3.bf16.msra.mxu0 %v913_v6 }
  0x91   :  { %915 = vmatprep.subr.bf16.mxu0 %v1102_v0 }
  0x94   :  { %917 = vmatpush3.bf16.msra.mxu0 %v916_v9 }
  0x95   :  { %918 = vmatprep.subr.bf16.mxu0 %v1102_v0 }
  0x98   :  { %920 = vmatpush3.bf16.msra.mxu0 %v919_v17  ;;  %v588_v17 = vld [vmem:[%s1335_s10] ss:$0 sm:$0xff] }
  0x99   :  { %945 = vmatprep.subr.bf16.mxu0 %v1102_v0 }
 0x14e   :  { %v196_v11 = vpop.f32.mrb[0].mxu0 }
 0x14f   :  { %v197_v12 = vadd.f32 %v584_v10, %v196_v11  ;;  %v708_v13 = vpop.f32.mrb[1].mxu0  ;;  %v497_v10 = vld [vmem:[#allocation9 + $0x70] sm:$0xff]  ;;  %v498_v11 = vld [vmem:[#allocation9 + $0x78] sm:$0xff] }
 0x150   :  { %v587_v13 = vld [vmem:[%s1333_s8] ss:$0 sm:$0xff] }
 0x151   :  { %v200_v14 = vmax.f32 %v197_v12, 0.0  ;;  %v967_v12 = vpack.c.bf16 %v498_v11, %v497_v10 }
 0x153   :  { %742 = vmatmul.mubr.f32.vlgmr.msra.gmra.mrb[0].mxu1 %v200_v14 }
 0x154   :  { %811 = vmatprep.mubr.msk.f32.mxu1 %vm1103_vm0, %v1104_v1  ;;  %923 = vmatpush3.bf16.msra.mxu1 %v922_v21 }
 0x155   :  { %924 = vmatprep.subr.bf16.mxu1 %v1102_v0 }
 0x158   :  { %926 = vmatpush3.bf16.msra.mxu1 %v925_v23 }
 0x159   :  { %927 = vmatprep.subr.bf16.mxu1 %v1102_v0 }
 0x15c   :  { %929 = vmatpush3.bf16.msra.mxu1 %v928_v26 }
 0x15d   :  { %930 = vmatprep.subr.bf16.mxu1 %v1102_v0 }
 0x160   :  { %932 = vmatpush3.bf16.msra.mxu1 %v931_v29 }
 0x161   :  { %933 = vmatprep.subr.bf16.mxu1 %v1102_v0 }
 0x164   :  { %935 = vmatpush3.bf16.msra.mxu1 %v934_v32 }
 0x165   :  { %936 = vmatprep.subr.bf16.mxu1 %v1102_v0 }
 0x168   :  { %938 = vmatpush3.bf16.msra.mxu1 %v937_v35 }
 0x169   :  { %939 = vmatprep.subr.bf16.mxu1 %v1102_v0 }
 0x16c   :  { %941 = vmatpush3.bf16.msra.mxu1 %v940_v38 }
 0x16d   :  { %942 = vmatprep.subr.bf16.mxu1 %v1102_v0 }
 0x170   :  { %944 = vmatpush3.bf16.msra.mxu1 %v943_v46 }
 0x226   :  { %v290_v40 = vpop.f32.mrb[0].mxu1 }
 0x227   :  { %v291_v41 = vadd.f32 %v585_v39, %v290_v40  ;;  %v743_v42 = vpop.f32.mrb[1].mxu1 }
 0x229   :  { %v294_v43 = vmax.f32 %v291_v41, 0.0 }
 0x22b   :  { %777 = vmatmul.mubr.f32.vlgmr.msra.gmra.mrb[2].mxu0 %v294_v43 }
 0x22c   :  { %846 = vmatprep.mubr.msk.f32.mxu0 %vm1103_vm0, %v1104_v1  ;;  %947 = vmatpush3.bf16.msra.mxu0 %v946_v50  ;;  %v489_v1 = vld [vmem:[#allocation9 + $0x30] sm:$0xff] }
 0x22d   :  { %948 = vmatprep.subr.bf16.mxu0 %v1102_v0  ;;  %v955_v57 = vpack.c.bf16 %v490_v56, %v489_v1 }
 0x230   :  { %950 = vmatpush3.bf16.msra.mxu0 %v949_v52 }
 0x231   :  { %951 = vmatprep.subr.bf16.mxu0 %v1102_v0 }
 0x234   :  { %953 = vmatpush3.bf16.msra.mxu0 %v952_v55 }
 0x235   :  { %954 = vmatprep.subr.bf16.mxu0 %v1102_v0 }
 0x238   :  { %956 = vmatpush3.bf16.msra.mxu0 %v955_v57 }
 0x239   :  { %957 = vmatprep.subr.bf16.mxu0 %v1102_v0 }
 0x23c   :  { %959 = vmatpush3.bf16.msra.mxu0 %v958_v60 }
 0x23d   :  { %960 = vmatprep.subr.bf16.mxu0 %v1102_v0 }
 0x240   :  { %962 = vmatpush3.bf16.msra.mxu0 %v961_v63 }
 0x241   :  { %963 = vmatprep.subr.bf16.mxu0 %v1102_v0 }
 0x244   :  { %965 = vmatpush3.bf16.msra.mxu0 %v964_v4 }
 0x245   :  { %966 = vmatprep.subr.bf16.mxu0 %v1102_v0 }
 0x248   :  { %968 = vmatpush3.bf16.msra.mxu0 %v967_v12 }
 0x2fe   :  { %v384_v6 = vpop.f32.mrb[2].mxu0 }
 0x2ff   :  { %v385_v7 = vadd.f32 %v586_v5, %v384_v6  ;;  %v778_v8 = vpop.f32.mrb[3].mxu0 }
 0x301   :  { %v388_v9 = vmax.f32 %v385_v7, 0.0 }
 0x303   :  { %812 = vmatmul.mubr.f32.vlgmr.msra.gmra.mrb[2].mxu1 %v388_v9 }
 0x3d6   :  { %v478_v14 = vpop.f32.mrb[2].mxu1 }
 0x3d7   :  { %v479_v15 = vadd.f32 %v587_v13, %v478_v14  ;;  %v813_v0 = vpop.f32.mrb[3].mxu1 }
 0x3d9   :  { %v482_v16 = vmax.f32 %v479_v15, 0.0 }
 0x3db   :  { %847 = vmatmul.mubr.f32.vlgmr.msra.gmra.mrb[4].mxu0 %v482_v16 }
 0x4ae   :  { %v572_v18 = vpop.f32.mrb[4].mxu0 }
 0x4af   :  { %v573_v19 = vadd.f32 %v588_v17, %v572_v18  ;;  %v848_v20 = vpop.f32.mrb[5].mxu0 }
 0x4b1   :  { %576 = vst [vmem:[%s1336_s11] sm:$0xff] %v573_v19 }
 0x4b2   :  { %581 = vsyncpa [#allocation3], 1 }
 0x4b3   :  { %582 = vsyncpa [#allocation5], 1 }
 0x4b4   :  { %583 = vsyncpa [#allocation8], 1 }

</bundles_post_ra>
